<compile_context>
chip_gen: v7x
topology: tpu7x:2x2x1
jax: 0.10.0
libtpu: 0.0.40
codegen_flags: <defaults>
</compile_context>

<pallas_src>
import jax
import jax.numpy as jnp
from jax.experimental import pallas as pl
from jax.experimental.pallas import tpu as pltpu


def _layer_norm(x, g, b, eps=1e-6):
    # PyTorch nn.LayerNorm (biased variance over last dim), eps = 1e-6 as in the module.
    mu = jnp.mean(x, axis=-1, keepdims=True)
    var = jnp.mean((x - mu) ** 2, axis=-1, keepdims=True)
    return (x - mu) * jax.lax.rsqrt(var + eps) * g + b


def _make_mha_kernel(n_head, d_k, d_v, return_attn):
    """Builds the fused MHA kernel.  Head offsets are static Python ints, so all
    per-head slices are static lane slices (no dynamic lane indexing)."""

    def kernel(xq_ref, xk_ref, xv_ref,
               wq_ref, wk_ref, wv_ref, wo_ref,
               lng_ref, lnb_ref,
               out_ref, *attn_refs):
        attn_ref = attn_refs[0] if return_attn else None

        Bt, Lq, D = xq_ref.shape
        _, Lk, _ = xk_ref.shape
        cdt = wq_ref.dtype  # bf16: MXU input dtype

        # Flatten (Bt, L, D) -> (Bt*L, D): more rows per MXU pass for the projections.
        xq2 = xq_ref[...].reshape(Bt * Lq, D)                 # f32, kept for residual
        xk2 = xk_ref[...].reshape(Bt * Lk, D)
        xv2 = xv_ref[...].reshape(Bt * Lk, D)

        # Cast activations to the MXU dtype exactly once.
        xq_c = xq2.astype(cdt)
        xk_c = xk2.astype(cdt)
        xv_c = xv2.astype(cdt)

        # Full-width projections for all heads at once (fills the MXU N dim).
        # 1/sqrt(d_k) is already folded into W_q.
        q_all = jnp.dot(xq_c, wq_ref[...], preferred_element_type=jnp.float32)
        k_all = jnp.dot(xk_c, wk_ref[...], preferred_element_type=jnp.float32)
        v_all = jnp.dot(xv_c, wv_ref[...], preferred_element_type=jnp.float32)

        # (Bt*L, H*d) -> (Bt, L, H*d): splits the sublane axis (free when L % 8 == 0).
        q_all = q_all.astype(cdt).reshape(Bt, Lq, n_head * d_k)
        k_all = k_all.astype(cdt).reshape(Bt, Lk, n_head * d_k)
        v_all = v_all.astype(cdt).reshape(Bt, Lk, n_head * d_v)

        ctx_parts = []
        for h in range(n_head):                               # static unroll over heads
            qh = q_all[:, :, h * d_k:(h + 1) * d_k]           # static lane slices
            kh = k_all[:, :, h * d_k:(h + 1) * d_k]
            vh = v_all[:, :, h * d_v:(h + 1) * d_v]

            # scores[b,i,j] = sum_d q[b,i,d] * k[b,j,d] — batched contraction over Bt,
            # contracting the last dims directly (no materialized k^T), f32 accumulation.
            s = jnp.einsum("bqd,bkd->bqk", qh, kh,
                           preferred_element_type=jnp.float32)

            # Softmax over the key axis (f32).  Exact divide so stored attention rows
            # sum to 1 (matches PyTorch F.softmax semantics).
            s = s - jnp.max(s, axis=-1, keepdims=True)
            e = jnp.exp(s)
            p = e / jnp.sum(e, axis=-1, keepdims=True)
            # TODO(synk): attention dropout (p=0.1) is identity (eval-mode semantics).

            if return_attn:
                attn_ref[:, h, :, :] = p.astype(attn_ref.dtype)

            # context_h = attn_h @ V_h, batched over Bt.
            ctx_parts.append(
                jnp.einsum("bqk,bkd->bqd", p.astype(cdt), vh,
                           preferred_element_type=jnp.float32))

        # concat_h(ctx_h) -> single full-width output projection (fills the MXU K dim).
        ctx = jnp.concatenate(ctx_parts, axis=-1).astype(cdt)
        ctx = ctx.reshape(Bt * Lq, n_head * d_v)

        y = jnp.dot(ctx, wo_ref[...], preferred_element_type=jnp.float32)
        # TODO(synk): output dropout (p=0.1) is identity (eval-mode semantics).
        y = y + xq2                                            # residual = original q input
        y = _layer_norm(y, lng_ref[...], lnb_ref[...])
        out_ref[...] = y.reshape(Bt, Lq, D).astype(out_ref.dtype)

    return kernel


def _vmem_capacity_bytes(default=64 * 1024 * 1024):
    """Physical VMEM of the local TPU (falls back to a conservative default)."""
    try:
        return int(pltpu.get_tpu_info().vmem_capacity_bytes)
    except Exception:
        return default


def _estimate_tile_vmem(bt, lq, lk, d_model, n_head, d_k, d_v, attn_bytes):
    """Rough per-grid-step VMEM footprint (double-buffered blocks + intermediates)."""
    f32, bf16 = 4, 2
    rows_q, rows_k = bt * lq, bt * lk
    inputs = 2 * (rows_q + 2 * rows_k) * d_model * f32          # xq/xk/xv, double-buffered
    weights = (2 * d_model * n_head * d_k
               + d_model * n_head * d_v
               + n_head * d_v * d_model) * bf16                 # resident (single copy)
    out_blk = 2 * rows_q * d_model * f32
    attn_blk = 2 * bt * n_head * lq * lk * attn_bytes
    interms = (rows_q * n_head * d_k + 2 * rows_k * n_head * d_k) * bf16 \
        + 3 * bt * lq * lk * f32 + rows_q * n_head * d_v * f32
    return inputs + weights + out_blk + attn_blk + interms


def _pick_block_b(batch, lq, lk, d_model, n_head, d_k, d_v, attn_bytes,
                  vmem_budget, min_grid=2):
    """Largest divisor Bt of `batch` whose tile fits the VMEM budget, while keeping
    at least min(min_grid, batch) grid steps (so both v7x TensorCores get work)."""
    best = 1
    for cand in range(1, batch + 1):
        if batch % cand:
            continue
        if batch // cand < min(min_grid, batch):
            continue
        if _estimate_tile_vmem(cand, lq, lk, d_model, n_head, d_k, d_v,
                               attn_bytes) > vmem_budget:
            continue
        best = cand
    return best


def multi_head_attention(q, k, v, params, *, block_b=None, return_attn=True,
                         attn_dtype=jnp.bfloat16):
    """MultiHeadAttention.forward (eval mode).
       q: (B, Lq, D), k/v: (B, Lk, D).
       Returns (output (B, Lq, D) f32, attn (B, H, Lq, Lk)) or just output if
       return_attn=False."""
    B, Lq, D = q.shape
    _, Lk, _ = k.shape
    n_head, d_k, d_v = params["n_head"], params["d_k"], params["d_v"]

    # Generation-aware VMEM budget: ~75% of physical VMEM (96 MiB on v5e/v6e's
    # 128 MiB, 48 MiB on v7x's 64 MiB per TensorCore).
    vmem_cap = _vmem_capacity_bytes()
    vmem_limit = max(32 * 1024 * 1024, min(int(vmem_cap * 0.75), 100 * 1024 * 1024))

    attn_bytes = jnp.dtype(attn_dtype).itemsize if return_attn else 0
    Bt = block_b or _pick_block_b(B, Lq, Lk, D, n_head, d_k, d_v, attn_bytes,
                                  vmem_budget=int(0.8 * vmem_limit))
    assert B % Bt == 0

    grid = (B // Bt,)

    seq_q_spec = pl.BlockSpec((Bt, Lq, D), lambda b: (b, 0, 0))
    seq_k_spec = pl.BlockSpec((Bt, Lk, D), lambda b: (b, 0, 0))
    # Weights: full-tensor blocks, constant index_map -> DMA'd once, VMEM-resident.
    wq_spec = pl.BlockSpec((D, n_head * d_k), lambda b: (0, 0))
    wk_spec = pl.BlockSpec((D, n_head * d_k), lambda b: (0, 0))
    wv_spec = pl.BlockSpec((D, n_head * d_v), lambda b: (0, 0))
    wo_spec = pl.BlockSpec((n_head * d_v, D), lambda b: (0, 0))
    ln_spec = pl.BlockSpec((1, D), lambda b: (0, 0))

    out_spec = pl.BlockSpec((Bt, Lq, D), lambda b: (b, 0, 0))

    if return_attn:
        out_shape = (jax.ShapeDtypeStruct((B, Lq, D), jnp.float32),
                     jax.ShapeDtypeStruct((B, n_head, Lq, Lk), attn_dtype))
        out_specs = [out_spec,
                     pl.BlockSpec((Bt, n_head, Lq, Lk), lambda b: (b, 0, 0, 0))]
    else:
        out_shape = jax.ShapeDtypeStruct((B, Lq, D), jnp.float32)
        out_specs = out_spec

    kernel = _make_mha_kernel(n_head, d_k, d_v, return_attn)

    result = pl.pallas_call(
        kernel,
        out_shape=out_shape,
        grid_spec=pltpu.PrefetchScalarGridSpec(
            num_scalar_prefetch=0,
            grid=grid,
            in_specs=[seq_q_spec, seq_k_spec, seq_k_spec,
                      wq_spec, wk_spec, wv_spec, wo_spec,
                      ln_spec, ln_spec],
            out_specs=out_specs,
        ),
        compiler_params=pltpu.CompilerParams(
            dimension_semantics=("parallel",),
            vmem_limit_bytes=vmem_limit,
        ),
    )(q, k, v,
      params["wq"], params["wk"], params["wv"], params["wo"],
      params["ln_g"], params["ln_b"])
    return result


def init_mha_params(key, d_model, n_head, d_k, d_v, scale=0.05):
    """Raw parameters in x @ W (in, out) layout, f32 (PyTorch-equivalent values)."""
    ks = jax.random.split(key, 4)
    return {
        "w_qs": scale * jax.random.normal(ks[0], (d_model, n_head * d_k), jnp.float32),
        "w_ks": scale * jax.random.normal(ks[1], (d_model, n_head * d_k), jnp.float32),
        "w_vs": scale * jax.random.normal(ks[2], (d_model, n_head * d_v), jnp.float32),
        "fc":   scale * jax.random.normal(ks[3], (n_head * d_v, d_model), jnp.float32),
        "ln_g": jnp.ones((d_model,), jnp.float32),
        "ln_b": jnp.zeros((d_model,), jnp.float32),
    }


def prepare_params(raw, n_head, d_k, d_v, compute_dtype=jnp.bfloat16):
    """One-time parameter transform (outside the hot path): fold 1/sqrt(d_k) into
       W_q and cast matmul weights to bf16 for the MXU.  Weights stay in the
       combined (D, H*d) layout so the kernel can run full-width projections."""
    d_model = raw["w_qs"].shape[0]
    return {
        "wq": (raw["w_qs"] / (d_k ** 0.5)).astype(compute_dtype),
        "wk": raw["w_ks"].astype(compute_dtype),
        "wv": raw["w_vs"].astype(compute_dtype),
        "wo": raw["fc"].astype(compute_dtype),
        "ln_g": raw["ln_g"].reshape(1, d_model).astype(jnp.float32),
        "ln_b": raw["ln_b"].reshape(1, d_model).astype(jnp.float32),
        "n_head": n_head, "d_k": d_k, "d_v": d_v,
    }


def mha_reference(q, k, v, raw, n_head, d_k, d_v):
    """Pure-JAX f32 reference matching the PyTorch module (eval mode)."""
    B, Lq, _ = q.shape

    def split(x, w, d):
        return (x @ w).reshape(B, -1, n_head, d).transpose(0, 2, 1, 3)  # (B,H,L,d)

    qh = split(q, raw["w_qs"], d_k)
    kh = split(k, raw["w_ks"], d_k)
    vh = split(v, raw["w_vs"], d_v)
    attn = jax.nn.softmax(
        jnp.einsum("bhqd,bhkd->bhqk", qh / (d_k ** 0.5), kh), axis=-1)
    ctx = jnp.einsum("bhqk,bhkd->bhqd", attn, vh)
    ctx = ctx.transpose(0, 2, 1, 3).reshape(B, Lq, n_head * d_v)
    out = ctx @ raw["fc"] + q
    mu = out.mean(-1, keepdims=True)
    var = ((out - mu) ** 2).mean(-1, keepdims=True)
    out = (out - mu) * jax.lax.rsqrt(var + 1e-6) * raw["ln_g"] + raw["ln_b"]
    return out, attn


if __name__ == "__main__":
    # Small shapes consistent with the module.
    B, L = 2, 8
    d_model = 32
    n_head, d_k, d_v = 2, 16, 16

    key = jax.random.PRNGKey(0)
    kq, kk, kv, kp = jax.random.split(key, 4)
    q_in = jax.random.normal(kq, (B, L, d_model), jnp.float32)
    k_in = jax.random.normal(kk, (B, L, d_model), jnp.float32)
    v_in = jax.random.normal(kv, (B, L, d_model), jnp.float32)

    raw = init_mha_params(kp, d_model, n_head, d_k, d_v)
    params = prepare_params(raw, n_head, d_k, d_v)

    out, attn = multi_head_attention(q_in, k_in, v_in, params)
    out = jax.block_until_ready(out)
    attn = jax.block_until_ready(attn)

    assert out.shape == (B, L, d_model)
    assert attn.shape == (B, n_head, L, L)
    assert bool(jnp.all(jnp.isfinite(out)))
    assert bool(jnp.all(jnp.isfinite(attn.astype(jnp.float32))))

    # Correctness vs pure-JAX f32 reference (tolerance for bf16 MXU inputs and
    # bf16 attn storage; softmax itself uses an exact divide).
    ref_out, ref_attn = mha_reference(q_in, k_in, v_in, raw, n_head, d_k, d_v)
    assert jnp.allclose(out, ref_out, atol=5e-2, rtol=5e-2)
    assert jnp.allclose(attn.astype(jnp.float32), ref_attn, atol=5e-2, rtol=5e-2)

    print("KERNEL_OK")
</pallas_src>

<mosaic_0001>
module attributes {stable_mosaic.version = 11 : i64} {
  func.func @kernel(%arg0: i32, %arg1: memref<1x8x32xf32, #tpu.memory_space<vmem>>, %arg2: memref<1x8x32xf32, #tpu.memory_space<vmem>>, %arg3: memref<1x8x32xf32, #tpu.memory_space<vmem>>, %arg4: memref<32x32xbf16, #tpu.memory_space<vmem>>, %arg5: memref<32x32xbf16, #tpu.memory_space<vmem>>, %arg6: memref<32x32xbf16, #tpu.memory_space<vmem>>, %arg7: memref<32x32xbf16, #tpu.memory_space<vmem>>, %arg8: memref<1x32xf32, #tpu.memory_space<vmem>>, %arg9: memref<1x32xf32, #tpu.memory_space<vmem>>, %arg10: memref<1x8x32xf32, #tpu.memory_space<vmem>>, %arg11: memref<1x2x8x8xbf16, #tpu.memory_space<vmem>>) attributes {dimension_semantics = [#tpu.dimension_semantics<parallel>], iteration_bounds = array<i64: 2>, scalar_prefetch = 0 : i64, scratch_operands = 0 : i64, tpu.core_type = #tpu.core_type<tc>, window_params = [{transform_indices = @transform_0, window_bounds = array<i64: 1, 8, 32>}, {transform_indices = @transform_1, window_bounds = array<i64: 1, 8, 32>}, {transform_indices = @transform_2, window_bounds = array<i64: 1, 8, 32>}, {pipeline_mode = #tpu.pipeline_mode<synchronous>, transform_indices = @transform_3, window_bounds = array<i64: 32, 32>}, {pipeline_mode = #tpu.pipeline_mode<synchronous>, transform_indices = @transform_4, window_bounds = array<i64: 32, 32>}, {pipeline_mode = #tpu.pipeline_mode<synchronous>, transform_indices = @transform_5, window_bounds = array<i64: 32, 32>}, {pipeline_mode = #tpu.pipeline_mode<synchronous>, transform_indices = @transform_6, window_bounds = array<i64: 32, 32>}, {pipeline_mode = #tpu.pipeline_mode<synchronous>, transform_indices = @transform_7, window_bounds = array<i64: 1, 32>}, {pipeline_mode = #tpu.pipeline_mode<synchronous>, transform_indices = @transform_8, window_bounds = array<i64: 1, 32>}, {transform_indices = @transform_9, window_bounds = array<i64: 1, 8, 32>}, {transform_indices = @transform_10, window_bounds = array<i64: 1, 2, 8, 8>}]} {
    %c0 = arith.constant 0 : index
    %c0_0 = arith.constant 0 : index
    %c0_1 = arith.constant 0 : index
    %0 = vector.load %arg1[%c0, %c0_0, %c0_1] : memref<1x8x32xf32, #tpu.memory_space<vmem>>, vector<1x8x32xf32>
    %1 = vector.shape_cast %0 : vector<1x8x32xf32> to vector<8x32xf32>
    %c0_2 = arith.constant 0 : index
    %c0_3 = arith.constant 0 : index
    %c0_4 = arith.constant 0 : index
    %2 = vector.load %arg2[%c0_2, %c0_3, %c0_4] : memref<1x8x32xf32, #tpu.memory_space<vmem>>, vector<1x8x32xf32>
    %3 = vector.shape_cast %2 : vector<1x8x32xf32> to vector<8x32xf32>
    %c0_5 = arith.constant 0 : index
    %c0_6 = arith.constant 0 : index
    %c0_7 = arith.constant 0 : index
    %4 = vector.load %arg3[%c0_5, %c0_6, %c0_7] : memref<1x8x32xf32, #tpu.memory_space<vmem>>, vector<1x8x32xf32>
    %5 = vector.shape_cast %4 : vector<1x8x32xf32> to vector<8x32xf32>
    %6 = arith.truncf %1 : vector<8x32xf32> to vector<8x32xbf16>
    %7 = arith.truncf %3 : vector<8x32xf32> to vector<8x32xbf16>
    %8 = arith.truncf %5 : vector<8x32xf32> to vector<8x32xbf16>
    %c0_8 = arith.constant 0 : index
    %c0_9 = arith.constant 0 : index
    %9 = vector.load %arg4[%c0_8, %c0_9] : memref<32x32xbf16, #tpu.memory_space<vmem>>, vector<32x32xbf16>
    %cst = arith.constant dense<0.000000e+00> : vector<8x32xf32>
    %10 = tpu.matmul %6, %9, %cst {dimension_numbers = #tpu.dot_dimension_numbers<[1], [0], [0], [1], [0, 0, 1, 1], [], []>} : vector<8x32xbf16>, vector<32x32xbf16>, vector<8x32xf32> -> vector<8x32xf32>
    %c0_10 = arith.constant 0 : index
    %c0_11 = arith.constant 0 : index
    %11 = vector.load %arg5[%c0_10, %c0_11] : memref<32x32xbf16, #tpu.memory_space<vmem>>, vector<32x32xbf16>
    %cst_12 = arith.constant dense<0.000000e+00> : vector<8x32xf32>
    %12 = tpu.matmul %7, %11, %cst_12 {dimension_numbers = #tpu.dot_dimension_numbers<[1], [0], [0], [1], [0, 0, 1, 1], [], []>} : vector<8x32xbf16>, vector<32x32xbf16>, vector<8x32xf32> -> vector<8x32xf32>
    %c0_13 = arith.constant 0 : index
    %c0_14 = arith.constant 0 : index
    %13 = vector.load %arg6[%c0_13, %c0_14] : memref<32x32xbf16, #tpu.memory_space<vmem>>, vector<32x32xbf16>
    %cst_15 = arith.constant dense<0.000000e+00> : vector<8x32xf32>
    %14 = tpu.matmul %8, %13, %cst_15 {dimension_numbers = #tpu.dot_dimension_numbers<[1], [0], [0], [1], [0, 0, 1, 1], [], []>} : vector<8x32xbf16>, vector<32x32xbf16>, vector<8x32xf32> -> vector<8x32xf32>
    %15 = arith.truncf %10 : vector<8x32xf32> to vector<8x32xbf16>
    %16 = vector.shape_cast %15 : vector<8x32xbf16> to vector<1x8x32xbf16>
    %17 = arith.truncf %12 : vector<8x32xf32> to vector<8x32xbf16>
    %18 = vector.shape_cast %17 : vector<8x32xbf16> to vector<1x8x32xbf16>
    %19 = arith.truncf %14 : vector<8x32xf32> to vector<8x32xbf16>
    %20 = vector.shape_cast %19 : vector<8x32xbf16> to vector<1x8x32xbf16>
    %21 = vector.extract_strided_slice %16 {offsets = [0, 0, 0], sizes = [1, 8, 16], strides = [1, 1, 1]} : vector<1x8x32xbf16> to vector<1x8x16xbf16>
    %22 = vector.extract_strided_slice %18 {offsets = [0, 0, 0], sizes = [1, 8, 16], strides = [1, 1, 1]} : vector<1x8x32xbf16> to vector<1x8x16xbf16>
    %23 = vector.extract_strided_slice %20 {offsets = [0, 0, 0], sizes = [1, 8, 16], strides = [1, 1, 1]} : vector<1x8x32xbf16> to vector<1x8x16xbf16>
    "tpu.trace_start"() <{level = 10 : i32, message = "bqd,bkd->bqk"}> : () -> ()
    %cst_16 = arith.constant dense<0.000000e+00> : vector<1x8x8xf32>
    %24 = tpu.matmul %21, %22, %cst_16 {dimension_numbers = #tpu.dot_dimension_numbers<[2], [2], [1], [1], [0, 0, 0, 1, 1, 1], [0], [0]>} : vector<1x8x16xbf16>, vector<1x8x16xbf16>, vector<1x8x8xf32> -> vector<1x8x8xf32>
    "tpu.trace_stop"() : () -> ()
    %cst_17 = arith.constant dense<0xFF800000> : vector<1x8xf32>
    %25 = vector.multi_reduction <maximumf>, %24, %cst_17 [2] : vector<1x8x8xf32> to vector<1x8xf32>
    %26 = vector.shape_cast %25 : vector<1x8xf32> to vector<1x8x1xf32>
    %27 = vector.broadcast %26 : vector<1x8x1xf32> to vector<1x8x8xf32>
    %28 = arith.subf %24, %27 : vector<1x8x8xf32>
    %29 = math.exp %28 : vector<1x8x8xf32>
    %cst_18 = arith.constant dense<0.000000e+00> : vector<1x8xf32>
    %30 = vector.multi_reduction <add>, %29, %cst_18 [2] : vector<1x8x8xf32> to vector<1x8xf32>
    %31 = vector.shape_cast %30 : vector<1x8xf32> to vector<1x8x1xf32>
    %32 = vector.broadcast %31 : vector<1x8x1xf32> to vector<1x8x8xf32>
    %33 = arith.divf %29, %32 : vector<1x8x8xf32>
    %34 = arith.truncf %33 : vector<1x8x8xf32> to vector<1x8x8xbf16>
    %c0_19 = arith.constant 0 : index
    %c0_20 = arith.constant 0 : index
    %c0_21 = arith.constant 0 : index
    %c0_22 = arith.constant 0 : index
    %35 = vector.load %arg11[%c0_19, %c0_20, %c0_21, %c0_22] : memref<1x2x8x8xbf16, #tpu.memory_space<vmem>>, vector<1x1x8x8xbf16>
    %36 = vector.shape_cast %35 : vector<1x1x8x8xbf16> to vector<1x8x8xbf16>
    %37 = vector.shape_cast %34 : vector<1x8x8xbf16> to vector<1x1x8x8xbf16>
    tpu.vector_store %arg11[%c0_19, %c0_20, %c0_21, %c0_22], %37 {strides = array<i32>} : memref<1x2x8x8xbf16, #tpu.memory_space<vmem>>, vector<1x1x8x8xbf16>,
    %38 = arith.truncf %33 : vector<1x8x8xf32> to vector<1x8x8xbf16>
    "tpu.trace_start"() <{level = 10 : i32, message = "bqk,bkd->bqd"}> : () -> ()
    %cst_23 = arith.constant dense<0.000000e+00> : vector<1x8x16xf32>
    %39 = tpu.matmul %38, %23, %cst_23 {dimension_numbers = #tpu.dot_dimension_numbers<[2], [1], [1], [2], [0, 0, 0, 1, 1, 2], [0], [0]>} : vector<1x8x8xbf16>, vector<1x8x16xbf16>, vector<1x8x16xf32> -> vector<1x8x16xf32>
    "tpu.trace_stop"() : () -> ()
    %40 = vector.extract_strided_slice %16 {offsets = [0, 0, 16], sizes = [1, 8, 16], strides = [1, 1, 1]} : vector<1x8x32xbf16> to vector<1x8x16xbf16>
    %41 = vector.extract_strided_slice %18 {offsets = [0, 0, 16], sizes = [1, 8, 16], strides = [1, 1, 1]} : vector<1x8x32xbf16> to vector<1x8x16xbf16>
    %42 = vector.extract_strided_slice %20 {offsets = [0, 0, 16], sizes = [1, 8, 16], strides = [1, 1, 1]} : vector<1x8x32xbf16> to vector<1x8x16xbf16>
    "tpu.trace_start"() <{level = 10 : i32, message = "bqd,bkd->bqk"}> : () -> ()
    %cst_24 = arith.constant dense<0.000000e+00> : vector<1x8x8xf32>
    %43 = tpu.matmul %40, %41, %cst_24 {dimension_numbers = #tpu.dot_dimension_numbers<[2], [2], [1], [1], [0, 0, 0, 1, 1, 1], [0], [0]>} : vector<1x8x16xbf16>, vector<1x8x16xbf16>, vector<1x8x8xf32> -> vector<1x8x8xf32>
    "tpu.trace_stop"() : () -> ()
    %cst_25 = arith.constant dense<0xFF800000> : vector<1x8xf32>
    %44 = vector.multi_reduction <maximumf>, %43, %cst_25 [2] : vector<1x8x8xf32> to vector<1x8xf32>
    %45 = vector.shape_cast %44 : vector<1x8xf32> to vector<1x8x1xf32>
    %46 = vector.broadcast %45 : vector<1x8x1xf32> to vector<1x8x8xf32>
    %47 = arith.subf %43, %46 : vector<1x8x8xf32>
    %48 = math.exp %47 : vector<1x8x8xf32>
    %cst_26 = arith.constant dense<0.000000e+00> : vector<1x8xf32>
    %49 = vector.multi_reduction <add>, %48, %cst_26 [2] : vector<1x8x8xf32> to vector<1x8xf32>
    %50 = vector.shape_cast %49 : vector<1x8xf32> to vector<1x8x1xf32>
    %51 = vector.broadcast %50 : vector<1x8x1xf32> to vector<1x8x8xf32>
    %52 = arith.divf %48, %51 : vector<1x8x8xf32>
    %53 = arith.truncf %52 : vector<1x8x8xf32> to vector<1x8x8xbf16>
    %c0_27 = arith.constant 0 : index
    %c1 = arith.constant 1 : index
    %c0_28 = arith.constant 0 : index
    %c0_29 = arith.constant 0 : index
    %54 = vector.load %arg11[%c0_27, %c1, %c0_28, %c0_29] : memref<1x2x8x8xbf16, #tpu.memory_space<vmem>>, vector<1x1x8x8xbf16>
    %55 = vector.shape_cast %54 : vector<1x1x8x8xbf16> to vector<1x8x8xbf16>
    %56 = vector.shape_cast %53 : vector<1x8x8xbf16> to vector<1x1x8x8xbf16>
    tpu.vector_store %arg11[%c0_27, %c1, %c0_28, %c0_29], %56 {strides = array<i32>} : memref<1x2x8x8xbf16, #tpu.memory_space<vmem>>, vector<1x1x8x8xbf16>,
    %57 = arith.truncf %52 : vector<1x8x8xf32> to vector<1x8x8xbf16>
    "tpu.trace_start"() <{level = 10 : i32, message = "bqk,bkd->bqd"}> : () -> ()
    %cst_30 = arith.constant dense<0.000000e+00> : vector<1x8x16xf32>
    %58 = tpu.matmul %57, %42, %cst_30 {dimension_numbers = #tpu.dot_dimension_numbers<[2], [1], [1], [2], [0, 0, 0, 1, 1, 2], [0], [0]>} : vector<1x8x8xbf16>, vector<1x8x16xbf16>, vector<1x8x16xf32> -> vector<1x8x16xf32>
    "tpu.trace_stop"() : () -> ()
    %59 = tpu.concatenate %39, %58 in 2 : vector<1x8x16xf32>, vector<1x8x16xf32> -> vector<1x8x32xf32>
    %60 = arith.truncf %59 : vector<1x8x32xf32> to vector<1x8x32xbf16>
    %61 = vector.shape_cast %60 : vector<1x8x32xbf16> to vector<8x32xbf16>
    %c0_31 = arith.constant 0 : index
    %c0_32 = arith.constant 0 : index
    %62 = vector.load %arg7[%c0_31, %c0_32] : memref<32x32xbf16, #tpu.memory_space<vmem>>, vector<32x32xbf16>
    %cst_33 = arith.constant dense<0.000000e+00> : vector<8x32xf32>
    %63 = tpu.matmul %61, %62, %cst_33 {dimension_numbers = #tpu.dot_dimension_numbers<[1], [0], [0], [1], [0, 0, 1, 1], [], []>} : vector<8x32xbf16>, vector<32x32xbf16>, vector<8x32xf32> -> vector<8x32xf32>
    %64 = arith.addf %63, %1 : vector<8x32xf32>
    %c0_34 = arith.constant 0 : index
    %c0_35 = arith.constant 0 : index
    %65 = vector.load %arg8[%c0_34, %c0_35] : memref<1x32xf32, #tpu.memory_space<vmem>>, vector<1x32xf32>
    %c0_36 = arith.constant 0 : index
    %c0_37 = arith.constant 0 : index
    %66 = vector.load %arg9[%c0_36, %c0_37] : memref<1x32xf32, #tpu.memory_space<vmem>>, vector<1x32xf32>
    %cst_38 = arith.constant dense<0.000000e+00> : vector<8xf32>
    %67 = vector.multi_reduction <add>, %64, %cst_38 [1] : vector<8x32xf32> to vector<8xf32>
    %68 = vector.shape_cast %67 : vector<8xf32> to vector<8x1xf32>
    %cst_39 = arith.constant 3.200000e+01 : f32
    %69 = vector.broadcast %cst_39 : f32 to vector<8x1xf32>
    %70 = arith.divf %68, %69 : vector<8x1xf32>
    %71 = vector.broadcast %70 : vector<8x1xf32> to vector<8x32xf32>
    %72 = arith.subf %64, %71 : vector<8x32xf32>
    %73 = arith.mulf %72, %72 : vector<8x32xf32>
    %cst_40 = arith.constant dense<0.000000e+00> : vector<8xf32>
    %74 = vector.multi_reduction <add>, %73, %cst_40 [1] : vector<8x32xf32> to vector<8xf32>
    %75 = vector.shape_cast %74 : vector<8xf32> to vector<8x1xf32>
    %cst_41 = arith.constant 3.200000e+01 : f32
    %76 = vector.broadcast %cst_41 : f32 to vector<8x1xf32>
    %77 = arith.divf %75, %76 : vector<8x1xf32>
    %78 = vector.broadcast %70 : vector<8x1xf32> to vector<8x32xf32>
    %79 = arith.subf %64, %78 : vector<8x32xf32>
    %cst_42 = arith.constant 9.99999997E-7 : f32
    %80 = vector.broadcast %cst_42 : f32 to vector<8x1xf32>
    %81 = arith.addf %77, %80 : vector<8x1xf32>
    %82 = math.rsqrt %81 : vector<8x1xf32>
    %83 = vector.broadcast %82 : vector<8x1xf32> to vector<8x32xf32>
    %84 = arith.mulf %79, %83 : vector<8x32xf32>
    %85 = vector.broadcast %65 : vector<1x32xf32> to vector<8x32xf32>
    %86 = arith.mulf %84, %85 : vector<8x32xf32>
    %87 = vector.broadcast %66 : vector<1x32xf32> to vector<8x32xf32>
    %88 = arith.addf %86, %87 : vector<8x32xf32>
    %89 = vector.shape_cast %88 : vector<8x32xf32> to vector<1x8x32xf32>
    %c0_43 = arith.constant 0 : index
    %c0_44 = arith.constant 0 : index
    %c0_45 = arith.constant 0 : index
    %90 = vector.load %arg10[%c0_43, %c0_44, %c0_45] : memref<1x8x32xf32, #tpu.memory_space<vmem>>, vector<1x8x32xf32>
    tpu.vector_store %arg10[%c0_43, %c0_44, %c0_45], %89 {strides = array<i32>} : memref<1x8x32xf32, #tpu.memory_space<vmem>>, vector<1x8x32xf32>,
    return
  }
  func.func @transform_0(%arg0: i32) -> (i32, i32, i32) {
    %c0_i32 = arith.constant 0 : i32
    %c0_i32_0 = arith.constant 0 : i32
    %c0_i32_1 = arith.constant 0 : i32
    return %arg0, %c0_i32, %c0_i32_0 : i32, i32, i32
  }
  func.func @transform_1(%arg0: i32) -> (i32, i32, i32) {
    %c0_i32 = arith.constant 0 : i32
    %c0_i32_0 = arith.constant 0 : i32
    %c0_i32_1 = arith.constant 0 : i32
    return %arg0, %c0_i32, %c0_i32_0 : i32, i32, i32
  }
  func.func @transform_2(%arg0: i32) -> (i32, i32, i32) {
    %c0_i32 = arith.constant 0 : i32
    %c0_i32_0 = arith.constant 0 : i32
    %c0_i32_1 = arith.constant 0 : i32
    return %arg0, %c0_i32, %c0_i32_0 : i32, i32, i32
  }
  func.func @transform_3(%arg0: i32) -> (i32, i32) {
    %c0_i32 = arith.constant 0 : i32
    %c0_i32_0 = arith.constant 0 : i32
    %c0_i32_1 = arith.constant 0 : i32
    return %c0_i32, %c0_i32_0 : i32, i32
  }
  func.func @transform_4(%arg0: i32) -> (i32, i32) {
    %c0_i32 = arith.constant 0 : i32
    %c0_i32_0 = arith.constant 0 : i32
    %c0_i32_1 = arith.constant 0 : i32
    return %c0_i32, %c0_i32_0 : i32, i32
  }
  func.func @transform_5(%arg0: i32) -> (i32, i32) {
    %c0_i32 = arith.constant 0 : i32
    %c0_i32_0 = arith.constant 0 : i32
    %c0_i32_1 = arith.constant 0 : i32
    return %c0_i32, %c0_i32_0 : i32, i32
  }
  func.func @transform_6(%arg0: i32) -> (i32, i32) {
    %c0_i32 = arith.constant 0 : i32
    %c0_i32_0 = arith.constant 0 : i32
    %c0_i32_1 = arith.constant 0 : i32
    return %c0_i32, %c0_i32_0 : i32, i32
  }
  func.func @transform_7(%arg0: i32) -> (i32, i32) {
    %c0_i32 = arith.constant 0 : i32
    %c0_i32_0 = arith.constant 0 : i32
    %c0_i32_1 = arith.constant 0 : i32
    return %c0_i32, %c0_i32_0 : i32, i32
  }
  func.func @transform_8(%arg0: i32) -> (i32, i32) {
    %c0_i32 = arith.constant 0 : i32
    %c0_i32_0 = arith.constant 0 : i32
    %c0_i32_1 = arith.constant 0 : i32
    return %c0_i32, %c0_i32_0 : i32, i32
  }
  func.func @transform_9(%arg0: i32) -> (i32, i32, i32) {
    %c0_i32 = arith.constant 0 : i32
    %c0_i32_0 = arith.constant 0 : i32
    %c0_i32_1 = arith.constant 0 : i32
    return %arg0, %c0_i32, %c0_i32_0 : i32, i32, i32
  }
  func.func @transform_10(%arg0: i32) -> (i32, i32, i32, i32) {
    %c0_i32 = arith.constant 0 : i32
    %c0_i32_0 = arith.constant 0 : i32
    %c0_i32_1 = arith.constant 0 : i32
    %c0_i32_2 = arith.constant 0 : i32
    return %arg0, %c0_i32, %c0_i32_0, %c0_i32_1 : i32, i32, i32, i32
  }
}

</mosaic_0001>

<bundles_post_ra>
// kernel: tpu_custom_call.1
= control target key start
LH: loop header
LB: loop body
LE: loop exit
PB: predicated region body
PF: predicated region fallthrough
CT: control target
= control target key end

     0   :  { %s2263_s0 = inlined_call_operand.hbm [shape: f32[2,8,32], index: 0, kind: input, shape index: {}]   ;;  %s2264_s1 = inlined_call_operand.hbm [shape: f32[2,8,32], index: 1, kind: input, shape index: {}]   ;;  %s2265_s2 = inlined_call_operand.hbm [shape: f32[2,8,32], index: 2, kind: input, shape index: {}]   ;;  %s2266_s3 = inlined_call_operand.hbm [shape: bf16[32,32], index: 3, kind: input, shape index: {}]   ;;  %s2267_s4 = inlined_call_operand.hbm [shape: bf16[32,32], index: 4, kind: input, shape index: {}]   ;;  %s2268_s5 = inlined_call_operand.vmem [shape: bf16[32,32], index: 5, kind: input, shape index: {}]   ;;  %s2269_s6 = inlined_call_operand.hbm [shape: bf16[32,32], index: 6, kind: input, shape index: {}]   ;;  %s2270_s7 = inlined_call_operand.vmem [shape: f32[1,32], index: 7, kind: input, shape index: {}]   ;;  %s2271_s8 = inlined_call_operand.vmem [shape: f32[1,32], index: 8, kind: input, shape index: {}]   ;;  %s2272_s9 = inlined_call_operand.hbm [shape: f32[2,8,32], index: 9, kind: output, shape index: {0}]   ;;  %s2273_s10 = inlined_call_operand.hbm [shape: bf16[2,2,8,8], index: 10, kind: output, shape index: {1}]  }
   0x1   :  { %2298 = sst [smem:[#allocation27_spill]] %s2264_s1 }
   0x2   :  { %2299 = sst [smem:[#allocation28_spill]] %s2266_s3 }
   0x3   :  { %2300 = sst [smem:[#allocation29_spill]] %s2270_s7 }
   0x4   :  { %2301 = sst [smem:[#allocation30_spill]] %s2271_s8 }
   0x5   :  { %2302 = sst [smem:[#allocation31_spill]] %s2272_s9 }
   0x6   :  { %2303 = sst [smem:[#allocation32_spill]] %s2273_s10 }
   0x7   :  { %16 = vsyncpa [#allocation3], 0 }
   0x8   :  { %18 = vsyncpa [#allocation3 + $0x1], 0 }
   0x9   :  { %19 = vsyncpa [#allocation6], 0 }
   0xa   :  { %21 = vsyncpa [#allocation6 + $0x1], 0 }
   0xb   :  { %22 = vsyncpa [#allocation9], 0 }
   0xc   :  { %23 = vsyncpa [#allocation12], 0 }
   0xd   :  { %24 = vsyncpa [#allocation4], 0 }
   0xe   :  { %26 = vsyncpa [#allocation4 + $0x1], 0 }
   0xf   :  { %27 = vsyncpa [#allocation15], 0 }
  0x10   :  { %29 = vsyncpa [#allocation15 + $0x1], 0  ;;  %s1817_s13 = smov 0   ;;  %s1819_s14 = smov 0  }
  0x11   :  { %s1821_s15 = smov 0   ;;  %s1823_s16 = smov 0  }
  0x12 LB: > { %2304 = sst [smem:[#allocation22_spill]] %s1732_s13  ;;  %s1838_s17 = sadd.s32 4294967295, %s1744_s16   ;;  %s1744_s16 = sphi %s1823_s16, %s2345_s16   ;;  %s1740_s15 = sphi %s1821_s15, %s2349_s15   ;;  %s1736_s14 = sphi %s1819_s14, %s2348_s14   ;;  %s1732_s13 = sphi %s1817_s13, %s2347_s13  }
  0x13   : > { %2305 = sst [smem:[#allocation23_spill]] %s1744_s16  ;;  %s1218_s18 = sadd.s32 4294967294, %s1744_s16  }
  0x14   : > { %p55_p0 = scmp.ne.s32.totalorder %s1736_s14, %s1732_s13  ;;  %p2275_p1 = scmp.eq.s32.totalorder %s1838_s17, 0 }
  0x15   : > { %p263_p3 = scmp.eq.s32.totalorder %s1218_s18, 1  ;;  %p1219_p5 = scmp.ge.s32.totalorder %s1744_s16, 1 }
  0x16   : > { %p1847_p4 = por %p2275_p1, %p55_p0  ;;  %p296_p7 = scmp.lt.s32.totalorder %s1744_s16, 3 }
  0x17   : > { %p1852_p6 = por %p263_p3, %p55_p0  ;;  %s1746_s22 = smov [#allocation8]  }
  0x18   : > { %s2306_s19 = scalar_select %p1847_p4, 1, 0 }
  0x19   : > { %s2307_s20 = scalar_select %p1852_p6, 1, 0 }
  0x1a   : > { %p1857_p8 = pnand %p1219_p5, %p296_p7  ;;  %s308_s23 = sshll.u32 %s1746_s22, 4  ;;  %s1861_s23 = int_to_ptr.vmem [resolvable:$true] %s308_s23 }
  0x1b   : > { %2308 = sst [smem:[#allocation24_spill]] %s2307_s20  ;;  %s1873_s25 = sadd.s32 1, %s1744_s16  }
  0x1c   : > { %s2309_s21 = scalar_select %p1857_p8, 1, 0 }
  0x1d   : > { %p1364_p9 = pneg %p1857_p8  ;;  %2311 = sst [smem:[#allocation25_spill]] %s1873_s25 }
  0x1e   : > { %s42_s26 = sadd.s32 1, %s1740_s15  ;;  %s39_s27 = ssub.s32 %s1744_s16, %s1873_s25 }
  0x1f   : > { %p1868_p11 = pnand %p1364_p9, %p2275_p1  ;;  %s2312_s3 = sld [smem:[#allocation28_spill]] }
  0x21   : > { %s2310_s24 = scalar_select %p1868_p11, 1, 0 }
  0x22   : > { %p1886_p13 = pneg %p1868_p11 }
  0x24   : > { %s2313_s18 = scalar_select %p1886_p13, 1, 0 }
  0x25   : > { %s1460_s30 = scalar_lea.hbm %s2312_s3, 256 }
  0x26   : > { %p1461_p12 = scmp.ne.s32.totalorder %s2312_s3, %s1460_s30  ;;  %p1467_p5 = scmp.lt.u32.totalorder %s1460_s30, %s2312_s3 }
  0x28   : > { %p1463_p0 = pnand %p1886_p13, %p1461_p12 }
  0x2a   : > { %p1464_p3 = pneg %p1463_p0 }
  0x2c   : > { %p1469_p7 = pnand %p1467_p5, %p1464_p3 }
  0x2e   : > { %1472 = shalt.err (!%p1469_p7)
}
  0x2f   : > { %s1473_s28 = scalar_lea.vmem %s1861_s23, 256  ;;  %p1481_p2 = scmp.lt.s32.totalorder %s1861_s23, %s1861_s23 }
  0x30   : > { %p1474_p9 = scmp.ne.s32.totalorder %s1861_s23, %s1473_s28  ;;  %p1482_p6 = scmp.lt.s32.totalorder %s1473_s28, %s1473_s28 }
  0x32   : > { %p1476_p10 = pnand %p1474_p9, %p1886_p13  ;;  %p1483_p12 = por %p1482_p6, %p1481_p2 }
  0x34   : > { %p1477_p1 = pneg %p1476_p10 }
  0x36   : > { %p1484_p0 = pnand %p1483_p12, %p1477_p1 }
  0x38   : > { %1487 = shalt.err (!%p1484_p0)
}
  0x39   : > { %s2279_s29 = smov 64   ;;  %s2281_s20 = smov 4  }
  0x3a   : > { %1367 = dma.hbm_to_vmem [thread:$0]  (!%p1868_p11), %s2312_s3, 256, %s1861_s23, [#allocation9], %s2279_s29, %s2279_s29, %s2281_s20  }
  0x3b   : > { %p40_p1 = scmp.eq.s32.totalorder %s39_s27, 0  ;;  %p49_p2 = scmp.ne.s32.totalorder %s1740_s15, %s1736_s14 }
  0x3c   : > { %p50_p6 = scmp.eq.s32.totalorder %s1744_s16, 0  ;;  %p1394_p10 = scmp.lt.s32.totalorder %s1744_s16, 2 }
  0x3d   : > { %s1915_s12 = scalar_select %p40_p1, %s1740_s15, %s42_s26  }
  0x3e   : > { %p51_p3 = por %p50_p6, %p49_p2  ;;  %p2315_p5 = scmp.eq.s32.totalorder %s1838_s17, 1 }
  0x3f   : > { %2314 = sst [smem:[#allocation26_spill]] %s1915_s12  ;;  %s2283_s28 = sand.u32 1, %s1740_s15  }
  0x40   : > { %p1919_p7 = por %p2315_p5, %p49_p2  ;;  %s1925_s25 = sshll.u32 %s1744_s16, 7 }
  0x41   : > { %s1929_s13 = sshll.u32 %s2283_s28, 3  ;;  %p1931_p9 = pnand %p1394_p10, %p51_p3 }
  0x42   : > { %s2316_s22 = scalar_select %p1919_p7, 1, 0 }
  0x43   : > { %s2317_s23 = scalar_select %p1931_p9, 1, 0 }
  0x44   : > { %s375_s26 = sand.u32 1, %s1744_s16   ;;  %s2318_s1 = sld [smem:[#allocation27_spill]] }
  0x45   : > { %s379_s29 = scalar_lea.vmem [#allocation5], %s1929_s13  ;;  %s1945_s28 = scalar_lea.sflag [#allocation6], %s375_s26 }
  0x46   : > { %s386_s20 = sshll.u32 %s379_s29, 4  ;;  %p1951_p0 = pneg %p1931_p9  ;;  %s1943_s20 = int_to_ptr.vmem [resolvable:$true] %s386_s20 }
  0x48   : > { %s2319_s12 = scalar_select %p1951_p0, 1, 0 }
  0x4a   : > { %s1940_s11 = scalar_lea.hbm %s2318_s1, %s1925_s25  ;;  %s1493_s16 = scalar_lea.hbm %s2318_s1, 256 }
  0x4b   : > { %s1488_s3 = scalar_lea.hbm %s1940_s11, 128  ;;  %p1494_p6 = scmp.lt.u32.totalorder %s1940_s11, %s2318_s1 }
  0x4c   : > { %p1489_p12 = scmp.ne.s32.totalorder %s1940_s11, %s1488_s3  ;;  %p1495_p10 = scmp.lt.u32.totalorder %s1493_s16, %s1488_s3 }
  0x4d   : > { %p1497_p5 = scmp.lt.u32.totalorder %s1488_s3, %s1940_s11 }
  0x4e   : > { %p1491_p1 = pnand %p1951_p0, %p1489_p12  ;;  %p1496_p3 = por %p1495_p10, %p1494_p6 }
  0x50   : > { %p1492_p2 = pneg %p1491_p1  ;;  %p1498_p7 = por %p1497_p5, %p1496_p3 }
  0x52   : > { %p1499_p4 = pnand %p1498_p7, %p1492_p2 }
  0x54   : > { %1502 = shalt.err (!%p1499_p4)
}
  0x55   : > { %s1503_s26 = scalar_lea.vmem %s1943_s20, 128  ;;  %s1749_s27 = smov [#allocation5]  }
  0x56   : > { %p1504_p12 = scmp.ne.s32.totalorder %s1943_s20, %s1503_s26  ;;  %s1508_s30 = sshll.u32 %s1749_s27, 4  ;;  %s1509_s30 = int_to_ptr.vmem [resolvable:$false] %s1508_s30 }
  0x57   : > { %s1510_s9 = scalar_lea.vmem %s1509_s30, 256  ;;  %p1511_p11 = scmp.lt.s32.totalorder %s1943_s20, %s1509_s30 }
  0x58   : > { %p1506_p1 = pnand %p1504_p12, %p1951_p0  ;;  %p1512_p13 = scmp.lt.s32.totalorder %s1510_s9, %s1503_s26 }
  0x5a   : > { %p1507_p8 = pneg %p1506_p1  ;;  %p1513_p6 = por %p1512_p13, %p1511_p11 }
  0x5c   : > { %p1514_p10 = pnand %p1513_p6, %p1507_p8 }
  0x5e   : > { %1517 = shalt.err (!%p1514_p10)
}
  0x5f   : > { %1380 = dma.hbm_to_vmem [thread:$0]  (!%p1931_p9), %s1940_s11, 128, %s1943_s20, %s1945_s28  }
  0x60   : > { %s1750_s3 = smov [#allocation10]   ;;  %s1751_s29 = smov [#allocation11]  }
  0x61   : > { %s321_s16 = sshll.u32 %s1750_s3, 4  ;;  %s337_s1 = sshll.u32 %s1751_s29, 4  ;;  %s322_s16 = int_to_ptr.vmem [resolvable:$true] %s321_s16  ;;  %s338_s1 = int_to_ptr.vmem [resolvable:$true] %s337_s1 }
  0x62   : > { %s1518_s30 = scalar_lea.hbm %s2267_s4, 256  ;;  %p2320_p8 = scmp.ne.s32.totalorder %s2313_s18, 0 }
  0x63   : > { %p1519_p4 = scmp.ne.s32.totalorder %s2267_s4, %s1518_s30  ;;  %p1525_p7 = scmp.lt.u32.totalorder %s1518_s30, %s2267_s4 }
  0x65   : > { %p1521_p11 = pnand %p1519_p4, %p2320_p8 }
  0x67   : > { %p1522_p13 = pneg %p1521_p11 }
  0x69   : > { %p1527_p2 = pnand %p1525_p7, %p1522_p13 }
  0x6b   : > { %1530 = shalt.err (!%p1527_p2)
}
  0x6c   : > { %s1531_s20 = scalar_lea.vmem %s322_s16, 256  ;;  %p1539_p1 = scmp.lt.s32.totalorder %s322_s16, %s322_s16 }
  0x6d   : > { %p1532_p3 = scmp.ne.s32.totalorder %s322_s16, %s1531_s20  ;;  %p1540_p6 = scmp.lt.s32.totalorder %s1531_s20, %s1531_s20 }
  0x6f   : > { %p1534_p5 = pnand %p1532_p3, %p2320_p8  ;;  %p1541_p10 = por %p1540_p6, %p1539_p1 }
  0x71   : > { %p1535_p12 = pneg %p1534_p5 }
  0x73   : > { %p1542_p9 = pnand %p1541_p10, %p1535_p12 }
  0x75   : > { %1545 = shalt.err (!%p1542_p9)
}
  0x76   : > { %p2321_p4 = scmp.ne.s32.totalorder %s2310_s24, 0  ;;  %s2322_s8 = smov 4  }
  0x77   : > { %s2323_s11 = smov 64   ;;  %s1546_s27 = scalar_lea.hbm %s2269_s6, 256 }
  0x78   : > { %1370 = dma.hbm_to_vmem [thread:$0]  (!%p2321_p4), %s2267_s4, 256, %s322_s16, [#allocation9], %s2323_s11, %s2323_s11, %s2322_s8  }
  0x79   : > { %p1547_p11 = scmp.ne.s32.totalorder %s2269_s6, %s1546_s27  ;;  %p1553_p7 = scmp.lt.u32.totalorder %s1546_s27, %s2269_s6 }
  0x7b   : > { %p1549_p9 = pnand %p1547_p11, %p2320_p8 }
  0x7d   : > { %p1550_p13 = pneg %p1549_p9 }
  0x7f   : > { %p1555_p2 = pnand %p1553_p7, %p1550_p13 }
  0x81   : > { %1558 = shalt.err (!%p1555_p2)
}
  0x82   : > { %s1559_s7 = scalar_lea.vmem %s338_s1, 256  ;;  %p1567_p1 = scmp.lt.s32.totalorder %s338_s1, %s338_s1 }
  0x83   : > { %p1560_p3 = scmp.ne.s32.totalorder %s338_s1, %s1559_s7  ;;  %p1568_p6 = scmp.lt.s32.totalorder %s1559_s7, %s1559_s7 }
  0x85   : > { %p1562_p5 = pnand %p1560_p3, %p2320_p8  ;;  %p1569_p10 = por %p1568_p6, %p1567_p1 }
  0x87   : > { %p1563_p12 = pneg %p1562_p5 }
  0x89   : > { %p1570_p0 = pnand %p1569_p10, %p1563_p12 }
  0x8b   : > { %1573 = shalt.err (!%p1570_p0)
}
  0x8c   : > { %1373 = dma.hbm_to_vmem [thread:$0]  (!%p2321_p4), %s2269_s6, 256, %s338_s1, [#allocation12], %s2323_s11, %s2323_s11, %s2322_s8  }
  0x8d   : > { %s2021_s29 = scalar_lea.hbm %s2263_s0, %s1925_s25  ;;  %s361_s24 = scalar_lea.vmem [#allocation2], %s1929_s13 }
  0x8e   : > { %s368_s27 = sshll.u32 %s361_s24, 4  ;;  %s2030_s9 = scalar_lea.hbm %s2265_s2, %s1925_s25  ;;  %s2024_s27 = int_to_ptr.vmem [resolvable:$true] %s368_s27 }
  0x8f   : > { %s2324_s20 = sand.u32 1, %s1740_s15   ;;  %s1574_s8 = scalar_lea.hbm %s2021_s29, 128 }
  0x90   : > { %s358_s1 = scalar_lea.sflag [#allocation3], %s2324_s20  ;;  %p1575_p0 = scmp.ne.s32.totalorder %s2021_s29, %s1574_s8 }
  0x91   : > { %p2325_p8 = scmp.ne.s32.totalorder %s2319_s12, 0  ;;  %s1579_s16 = scalar_lea.hbm %s2263_s0, 256 }
  0x92   : > { %p1580_p9 = scmp.lt.u32.totalorder %s2021_s29, %s2263_s0  ;;  %p1581_p13 = scmp.lt.u32.totalorder %s1579_s16, %s1574_s8 }
  0x93   : > { %p1577_p4 = pnand %p1575_p0, %p2325_p8  ;;  %p1583_p2 = scmp.lt.u32.totalorder %s1574_s8, %s2021_s29 }
  0x94   : > { %p1582_p7 = por %p1581_p13, %p1580_p9 }
  0x95   : > { %p1578_p11 = pneg %p1577_p4 }
  0x96   : > { %p1584_p3 = por %p1583_p2, %p1582_p7 }
  0x98   : > { %p1585_p5 = pnand %p1584_p3, %p1578_p11 }
  0x9a   : > { %1588 = shalt.err (!%p1585_p5)
}
  0x9b   : > { %s1589_s25 = scalar_lea.vmem %s2024_s27, 128  ;;  %s1752_s3 = smov [#allocation2]  }
  0x9c   : > { %p1590_p12 = scmp.ne.s32.totalorder %s2024_s27, %s1589_s25  ;;  %s1594_s24 = sshll.u32 %s1752_s3, 4  ;;  %s1595_s24 = int_to_ptr.vmem [resolvable:$false] %s1594_s24 }
  0x9d   : > { %s1596_s30 = scalar_lea.vmem %s1595_s24, 256  ;;  %p1597_p10 = scmp.lt.s32.totalorder %s2024_s27, %s1595_s24 }
  0x9e   : > { %p1592_p1 = pnand %p1590_p12, %p2325_p8  ;;  %p1598_p0 = scmp.lt.s32.totalorder %s1596_s30, %s1589_s25 }
  0xa0   : > { %p1593_p6 = pneg %p1592_p1  ;;  %p1599_p4 = por %p1598_p0, %p1597_p10 }
  0xa2   : > { %p1600_p9 = pnand %p1599_p4, %p1593_p6 }
  0xa4   : > { %1603 = shalt.err (!%p1600_p9)
}
  0xa5   : > { %p2326_p11 = scmp.ne.s32.totalorder %s2317_s23, 0  ;;  %s397_s26 = scalar_lea.vmem [#allocation7], %s1929_s13 }
  0xa6   : > { %s404_s20 = sshll.u32 %s397_s26, 4  ;;  %s1604_s8 = scalar_lea.hbm %s2030_s9, 128  ;;  %s405_s20 = int_to_ptr.vmem [resolvable:$true] %s404_s20 }
  0xa7   : > { %1377 = dma.hbm_to_vmem [thread:$0]  (!%p2326_p11), %s2021_s29, 128, %s2024_s27, %s358_s1  }
  0xa8   : > { %p1605_p13 = scmp.ne.s32.totalorder %s2030_s9, %s1604_s8  ;;  %s1609_s16 = scalar_lea.hbm %s2265_s2, 256 }
  0xa9   : > { %p1610_p3 = scmp.lt.u32.totalorder %s2030_s9, %s2265_s2  ;;  %p1611_p5 = scmp.lt.u32.totalorder %s1609_s16, %s1604_s8 }
  0xaa   : > { %p1607_p7 = pnand %p1605_p13, %p2325_p8  ;;  %p1613_p1 = scmp.lt.u32.totalorder %s1604_s8, %s2030_s9 }
  0xab   : > { %p1612_p12 = por %p1611_p5, %p1610_p3 }
  0xac   : > { %p1608_p2 = pneg %p1607_p7 }
  0xad   : > { %p1614_p6 = por %p1613_p1, %p1612_p12 }
  0xaf   : > { %p1615_p10 = pnand %p1614_p6, %p1608_p2 }
  0xb1   : > { %1618 = shalt.err (!%p1615_p10)
}
  0xb2   : > { %s1619_s13 = scalar_lea.vmem %s405_s20, 128  ;;  %s1753_s29 = smov [#allocation7]  }
  0xb3   : > { %p1620_p0 = scmp.ne.s32.totalorder %s405_s20, %s1619_s13  ;;  %s1624_s27 = sshll.u32 %s1753_s29, 4  ;;  %s1625_s27 = int_to_ptr.vmem [resolvable:$false] %s1624_s27 }
  0xb4   : > { %s1626_s1 = scalar_lea.vmem %s1625_s27, 256  ;;  %p1627_p13 = scmp.lt.s32.totalorder %s405_s20, %s1625_s27 }
  0xb5   : > { %p1622_p4 = pnand %p1620_p0, %p2325_p8  ;;  %p1628_p7 = scmp.lt.s32.totalorder %s1626_s1, %s1619_s13 }
  0xb7   : > { %p1623_p9 = pneg %p1622_p4  ;;  %p1629_p11 = por %p1628_p7, %p1627_p13 }
  0xb9   : > { %p1630_p3 = pnand %p1629_p11, %p1623_p9 }
  0xbb   : > { %1633 = shalt.err (!%p1630_p3)
}
  0xbc   : > { %p2327_p5 = scmp.ne.s32.totalorder %s2317_s23, 0  ;;  %p2328_p2 = scmp.ne.s32.totalorder %s2309_s21, 0 }
  0xbd   : > { %s2077_s12 = sand.u32 (!%p2328_p2), 1, %s1736_s14   ;;  %p2329_p8 = scmp.ne.s32.totalorder (!%p2328_p2), %s2306_s19, 0 }
  0xbe   : > { %1383 = dma.hbm_to_vmem [thread:$0]  (!%p2327_p5), %s2030_s9, 128, %s405_s20, %s1945_s28  }
  0xbf   : > { %413 = sbr.rel (%p2328_p2) target bundleno = 1954 (0x7a2), region = 56  ;;  %s2080_s25 = sshll.u32 (!%p2328_p2), %s2077_s12, 3 }
  0xc0   : > { %s416_s3 = scalar_lea.sflag (!%p2328_p2), [#allocation3], %s2077_s12  ;;  %s419_s24 = scalar_lea.vmem (!%p2328_p2), [#allocation2], %s2080_s25 }
  0xc6   : > { %1707 = dma.done.wait (%p2329_p8), %s416_s3, 128  }
  0xc7   : > { %1709 = vsyncadd (%p2329_p8), %s416_s3, 4294967168  ;;  %s424_s21 = sand.u32 1, %s1838_s17   ;;  %s428_s23 = scalar_lea.vmem [#allocation5], %s2080_s25 }
  0xc8   : > { %s425_s28 = scalar_lea.sflag [#allocation6], %s424_s21 }
  0xc9   : > { %1711 = dma.done.wait (%p2329_p8), %s425_s28, 256  }
  0xca   : > { %1713 = vsyncadd (%p2329_p8), %s425_s28, 4294967040  ;;  %s437_s9 = scalar_lea.vmem [#allocation7], %s2080_s25  ;;  %p2330_p11 = scmp.eq.s32.totalorder %s1838_s17, 0 }
  0xcc   : > { %1715 = dma.done.wait (%p2330_p11), [#allocation9], 512   ;;  %p2331_p12 = pmov %p2330_p11 }
  0xcd   : > { %p2332_p1 = pmov %p2330_p11 }
  0xce   : > { %1717 = vsyncadd (%p2331_p12), [#allocation9], 4294966784 }
  0xcf   : > { %1719 = dma.done.wait (%p2332_p1), [#allocation12], 256   ;;  %p2333_p6 = pmov %p2332_p1 }
  0xd0   : > { %v1754_v0 = vmov 0.0   ;;  %vm1755_vm0 = vmmov 0   ;;  %v1442_v1 = vld [vmem:[#allocation10] sm:$0xff]   ;;  %v1443_v2 = vld [vmem:[#allocation10 + $0x8] sm:$0xff]   ;;  %v1444_v3 = vld [vmem:[#allocation8] sm:$0xff]   ;;  %vm524_vm1 = vcmask 261120  }
  0xd1   : > { %1721 = vsyncadd (%p2333_p6), [#allocation12], 4294967040  ;;  %1294 = vmatprep.subr.bf16.mxu1 %v1754_v0  ;;  %1286 = vmatprep.subr.bf16.mxu0 %v1754_v0  ;;  %v503_v4 = vld [vmem:[%s428_s23] sm:$0xff]  ;;  %v2110_v6 = vld [vmem:[%s419_s24] sm:$0xff]  ;;  %vm689_vm2 = vcmask 130048   ;;  %s1756_s19 = smov 112  }
  0xd2   : > { %1298 = vmatprep.mubr.msk.bf16.mxu1 %vm1755_vm0, %v1754_v0  ;;  %1290 = vmatprep.mubr.msk.bf16.mxu0 %vm1755_vm0, %v1754_v0  ;;  %v1445_v5 = vld [vmem:[#allocation8 + $0x8] sm:$0xff]   ;;  %v506_v7 = vpack.c.bf16 %v503_v4, %v503_v4  ;;  %v505_v8 = vpack.c.bf16 %v2110_v6, %v2110_v6  ;;  %v1446_v20 = vld [vmem:[%s2268_s5] sm:$0xff]   ;;  %v1447_v21 = vld [vmem:[%s2268_s5 + $0x8] sm:$0xff]   ;;  %vm736_vm3 = vcmask 64512   ;;  %vm754_vm4 = vcmask 1043456   ;;  %s2157_s11 = scalar_lea.vmem [#allocation14], %s2080_s25 }
  0xd3   : > { %1295 = vmatpush3.bf16.msra.mxu1 %v1442_v1  ;;  %1287 = vmatpush3.bf16.msra.mxu0 %v1444_v3  ;;  %v504_v22 = vld [vmem:[%s437_s9] sm:$0xff]  ;;  %vm749_vm5 = vcmask 60416   ;;  %v1448_v63 = vld [vmem:[#allocation11] sm:$0xff]   ;;  %s1757_s7 = smov 16   ;;  %s1260_s16 = sshll.u32 %s1838_s17, 7 }
  0xd4   : > { %1296 = vmatprep.subr.bf16.mxu1 %v1754_v0  ;;  %1288 = vmatprep.subr.bf16.mxu0 %v1754_v0  ;;  %v507_v23 = vpack.c.bf16 %v504_v22, %v504_v22  ;;  %s2334_s13 = sld [smem:[#allocation32_spill]]  ;;  %s1041_s1 = sshll.u32 %s2157_s11, 4  ;;  %s2180_s1 = int_to_ptr.vmem [resolvable:$true] %s1041_s1 }
  0xd5   : > { %s1015_s3 = scalar_lea.sflag [#allocation15], %s2077_s12  ;;  %s1634_s24 = scalar_lea.vmem %s2180_s1, 128 }
  0xd6   : > { %p1635_p10 = scmp.ne.s32.totalorder %s2180_s1, %s1634_s24  ;;  %p2336_p0 = scmp.ne.s32.totalorder %s2316_s22, 0 }
  0xd7   : > { %1297 = vmatpush3.bf16.msra.mxu1 %v1443_v2  ;;  %1289 = vmatpush3.bf16.msra.mxu0 %v1445_v5  ;;  %v1449_v5 = vld [vmem:[#allocation11 + $0x8] sm:$0xff]   ;;  %s1758_s21 = smov [#allocation14]  }
  0xd8   : > { %1310 = vmatprep.subr.bf16.mxu1 %v1754_v0  ;;  %1302 = vmatprep.subr.bf16.mxu0 %v1754_v0  ;;  %p1636_p4 = pnand %p1635_p10, %p2336_p0  ;;  %s1638_s28 = sshll.u32 %s1758_s21, 4  ;;  %s1639_s28 = int_to_ptr.vmem [resolvable:$false] %s1638_s28 }
  0xd9   : > { %s1640_s23 = scalar_lea.vmem %s1639_s28, 256  ;;  %p1641_p13 = scmp.lt.s32.totalorder %s2180_s1, %s1639_s28 }
  0xda   : > { %1299 = vmatmul.mubr.msk.bf16.vlgmr.msra.gmra.mrb[0].mxu1 %vm524_vm1, %v506_v7  ;;  %1291 = vmatmul.mubr.msk.bf16.vlgmr.msra.gmra.mrb[0].mxu0 %vm524_vm1, %v505_v8  ;;  %s2335_s29 = smov %s2334_s13  ;;  %s2177_s27 = scalar_lea.hbm %s2334_s13, %s1260_s16 }
  0xdb   : > { %1312 = vmatprep.mubr.msk.bf16.mxu1 %vm1755_vm0, %v1754_v0  ;;  %1306 = vmatprep.mubr.msk.bf16.mxu0 %vm1755_vm0, %v1754_v0  ;;  %p1637_p9 = pneg %p1636_p4  ;;  %p1642_p7 = scmp.lt.s32.totalorder %s1640_s23, %s1634_s24 }
  0xdc   : > { %1303 = vmatpush3.bf16.msra.mxu0 %v1446_v20 }
  0xdd   : > { %1304 = vmatprep.subr.bf16.mxu0 %v1754_v0  ;;  %p1643_p3 = por %p1642_p7, %p1641_p13 }
  0xdf   : > { %p1644_p5 = pnand %p1643_p3, %p1637_p9 }
  0xe0   : > { %1305 = vmatpush3.bf16.msra.mxu0 %v1447_v21 }
  0xe1   : > { %1316 = vmatprep.subr.bf16.mxu0 %v1754_v0 }
  0xe3   : > { %1307 = vmatmul.mubr.msk.bf16.vlgmr.msra.gmra.mrb[4].mxu0 %vm524_vm1, %v507_v23 }
  0xe4   : > { %1318 = vmatprep.mubr.msk.bf16.mxu0 %vm1755_vm0, %v1754_v0 }
 0x1ad   : > { %v621_v9 = vpop.f32.mrb[0].mxu1  ;;  %v562_v13 = vpop.f32.mrb[0].mxu0 }
 0x1ae   : > { %v687_v10 = vpack.c.bf16 %v621_v9, %v621_v9  ;;  %v1300_v11 = vpop.f32.mrb[1].mxu1  ;;  %v686_v16 = vpack.c.bf16 %v562_v13, %v562_v13  ;;  %v1292_v17 = vpop.f32.mrb[1].mxu0 }
 0x1af   : > { %v624_v12 = vpop.f32.mrb[2].mxu1  ;;  %v565_v18 = vpop.f32.mrb[2].mxu0 }
 0x1b0   : > { %v694_v14 = vsel %vm689_vm2, %v687_v10, 0  ;;  %802 = vrot.lane.b32.xlu0 %v687_v10, %s1756_s19  ;;  %v1301_v15 = vpop.f32.mrb[3].mxu1  ;;  %v1293_v19 = vpop.f32.mrb[3].mxu0 }
 0x1b1   : > { %1311 = vmatpush3.bf16.xpose.msra.mxu1 %v694_v14 }
 0x1b2   : > { %1322 = vmatprep.subr.bf16.mxu1 %v1754_v0 }
 0x1b4   : > { %799 = vrot.lane.b32.xlu0 %v686_v16, %s1756_s19 }
 0x1b6   : > { %v680_v42 = vpop.f32.mrb[4].mxu0 }
 0x1b7   : > { %v1308_v43 = vpop.f32.mrb[5].mxu0  ;;  %v688_v46 = vpack.c.bf16 %v680_v42, %v680_v42 }
 0x1b8   : > { %1313 = vmatmul.mubr.msk.bf16.vlgmr.msra.gmra.mrb[4].mxu1 %vm689_vm2, %v686_v16  ;;  %v683_v44 = vpop.f32.mrb[6].mxu0 }
 0x1b9   : > { %1324 = vmatprep.mubr.msk.bf16.mxu1 %vm1755_vm0, %v1754_v0  ;;  %v1309_v45 = vpop.f32.mrb[7].mxu0  ;;  %v756_v47 = vsel %vm754_vm4, %v688_v46, 0 }
 0x1ba   : > { %1317 = vmatpush3.bf16.msra.mxu0 %v756_v47 }
 0x1bb   : > { %1328 = vmatprep.subr.bf16.mxu0 %v1754_v0 }
 0x222   : > { %v803_v24 = vpop.permute.xlu0 %802 }
 0x223   : > { %v808_v25 = vsel %vm689_vm2, %v803_v24, 0 }
 0x224   : > { %1323 = vmatpush3.bf16.xpose.msra.mxu1 %v808_v25 }
 0x225   : > { %1334 = vmatprep.subr.bf16.mxu1 %v1754_v0 }
 0x226   : > { %v800_v26 = vpop.permute.xlu0 %799 }
 0x22b   : > { %1325 = vmatmul.mubr.msk.bf16.vlgmr.msra.gmra.mrb[8].mxu1 %vm689_vm2, %v800_v26 }
 0x22c   : > { %1338 = vmatprep.mubr.msk.bf16.mxu1 %vm1755_vm0, %v1754_v0  ;;  %1335 = vmatpush3.bf16.msra.mxu1 %v1448_v63 }
 0x22d   : > { %1336 = vmatprep.subr.bf16.mxu1 %v1754_v0 }
 0x230   : > { %1337 = vmatpush3.bf16.msra.mxu1 %v1449_v5 }
 0x28b   : > { %v730_v27 = vpop.f32.mrb[4].mxu1 }
 0x28c   : > { %v1314_v28 = vpop.f32.mrb[5].mxu1  ;;  %v737_v29 = vsel %vm736_vm3, %v730_v27, -inf }
 0x28d   : > { %738 = vmax.xlane.f32.xlu1 %v737_v29  ;;  %v733_v30 = vpop.f32.mrb[6].mxu1 }
 0x28e   : > { %v1315_v31 = vpop.f32.mrb[7].mxu1 }
 0x2fe   : > { %v844_v32 = vpop.f32.mrb[8].mxu1 }
 0x2ff   : > { %v1326_v33 = vpop.f32.mrb[9].mxu1  ;;  %v850_v34 = vsel %vm736_vm3, %v844_v32, -inf }
 0x300   : > { %851 = vmax.xlane.f32.xlu1 %v850_v34  ;;  %v847_v35 = vpop.f32.mrb[10].mxu1 }
 0x301   : > { %v1327_v36 = vpop.f32.mrb[11].mxu1 }
 0x31a   : > { %v739_v37 = vpop.xlane.xlu1 %738 }
 0x31b   : > { %v740_v38 = vsub.f32 %v730_v27, %v739_v37 }
 0x31d   : > { %v741_v39 = vmul.f32 1.442695, %v740_v38 }
 0x31f   : > { %1450 = vpow2.f32 %v741_v39 }
 0x329   : > { %v1451_v40 = vpop.eup %1450 }
 0x32a   : > { %v743_v41 = vsel %vm736_vm3, %v1451_v40, 0.0 }
 0x32b   : > { %744 = vadd.xlane.f32.xlu0 %v743_v41 }
 0x38d   : > { %v852_v48 = vpop.xlane.xlu1 %851 }
 0x38e   : > { %v853_v49 = vsub.f32 %v844_v32, %v852_v48 }
 0x390   : > { %v854_v50 = vmul.f32 1.442695, %v853_v49 }
 0x392   : > { %1452 = vpow2.f32 %v854_v50 }
 0x39c   : > { %v1453_v51 = vpop.eup %1452 }
 0x39d   : > { %v856_v52 = vsel %vm736_vm3, %v1453_v51, 0.0 }
 0x39e   : > { %857 = vadd.xlane.f32.xlu1 %v856_v52 }
 0x3af   : > { %865 = vrot.lane.b32.xlu1 %v688_v46, %s1756_s19 }
 0x3b8   : > { %v745_v53 = vpop.xlane.xlu0 %744 }
 0x3b9   : > { %1454 = vrcp.f32 %v745_v53 }
 0x3c3   : > { %v1455_v54 = vpop.eup %1454 }
 0x3c4   : > { %v747_v55 = vmul.f32 %v1455_v54, %v1451_v40 }
 0x3c6   : > { %v748_v56 = vpack.c.bf16 %v747_v55, %v747_v55 }
 0x3c8   : > { %1319 = vmatmul.mubr.msk.bf16.vlgmr.msra.gmra.mrb[8].mxu0 %vm736_vm3, %v748_v56  ;;  %750 = vst.msk [vmem:[%s2157_s11] sm:$0xf] %vm749_vm5, %v748_v56 }
 0x3c9   : > { %1330 = vmatprep.mubr.msk.bf16.mxu0 %vm1755_vm0, %v1754_v0 }
 0x42b   : > { %v858_v57 = vpop.xlane.xlu1 %857 }
 0x42c   : > { %1456 = vrcp.f32 %v858_v57 }
 0x42f   : > { %v866_v58 = vpop.permute.xlu1 %865 }
 0x430   : > { %v871_v59 = vsel %vm754_vm4, %v866_v58, 0 }
 0x431   : > { %1329 = vmatpush3.bf16.msra.mxu0 %v871_v59 }
 0x436   : > { %v1457_v60 = vpop.eup %1456 }
 0x437   : > { %v860_v61 = vmul.f32 %v1457_v60, %v1453_v51 }
 0x439   : > { %v861_v62 = vpack.c.bf16 %v860_v61, %v860_v61 }
 0x43b   : > { %1331 = vmatmul.mubr.msk.bf16.vlgmr.msra.gmra.mrb[12].mxu0 %vm736_vm3, %v861_v62  ;;  %1251 = vst.msk [vmem:[%s2157_s11 + $0x4] sm:$0xf] %vm749_vm5, %v861_v62 }
 0x49b   : > { %v792_v1 = vpop.f32.mrb[8].mxu0 }
 0x49c   : > { %v1320_v2 = vpop.f32.mrb[9].mxu0 }
 0x49d   : > { %v795_v3 = vpop.f32.mrb[10].mxu0 }
 0x49e   : > { %v1321_v4 = vpop.f32.mrb[11].mxu0 }
 0x50e   : > { %v907_v7 = vpop.f32.mrb[12].mxu0 }
 0x50f   : > { %914 = vrot.lane.b32.xlu1 %v907_v7, %s1757_s7  ;;  %v1332_v8 = vpop.f32.mrb[13].mxu0 }
 0x510   : > { %v910_v9 = vpop.f32.mrb[14].mxu0 }
 0x511   : > { %v1333_v10 = vpop.f32.mrb[15].mxu0 }
 0x581   : > { %v915_v11 = vpop.permute.xlu1 %914 }
 0x582   : > { %v917_v12 = vsel %vm689_vm2, %v792_v1, %v915_v11 }
 0x583   : > { %v918_v13 = vpack.c.bf16 %v917_v12, %v917_v12 }
 0x585   : > { %1339 = vmatmul.mubr.msk.bf16.vlgmr.msra.gmra.mrb[12].mxu1 %vm524_vm1, %v918_v13 }
 0x658   : > { %v972_v0 = vpop.f32.mrb[12].mxu1 }
 0x659   : > { %v973_v14 = vadd.f32 %v972_v0, %v2110_v6  ;;  %v1340_v15 = vpop.f32.mrb[13].mxu1 }
 0x65a   : > { %v975_v16 = vpop.f32.mrb[14].mxu1 }
 0x65b   : > { %v1341_v17 = vpop.f32.mrb[15].mxu1  ;;  %v980_v18 = vsel %vm524_vm1, %v973_v14, 0.0 }
 0x65c   : > { %981 = vadd.xlane.f32.xlu1 %v980_v18 }
 0x6e9   : > { %v982_v19 = vpop.xlane.xlu1 %981 }
 0x6ea   : > { %v984_v20 = vmul.f32 0.03125, %v982_v19 }
 0x6ec   : > { %v985_v21 = vsub.f32 %v973_v14, %v984_v20 }
 0x6ee   : > { %v986_v22 = vmul.f32 %v985_v21, %v985_v21 }
 0x6f0   : > { %v987_v23 = vsel %vm524_vm1, %v986_v22, 0.0 }
 0x6f1   : > { %988 = vadd.xlane.f32.xlu0 %v987_v23 }
 0x6f2   : > { %1647 = shalt.err (!%p1644_p5)
}
 0x6f3   : > { %s1648_s9 = scalar_lea.hbm %s2177_s27, 128  ;;  %s1652_s26 = scalar_lea.hbm %s2335_s29, 256 }
 0x6f4   : > { %p1649_p2 = scmp.ne.s32.totalorder %s2177_s27, %s1648_s9  ;;  %p1653_p12 = scmp.lt.u32.totalorder %s2177_s27, %s2335_s29 }
 0x6f5   : > { %p1654_p1 = scmp.lt.u32.totalorder %s1652_s26, %s1648_s9  ;;  %p1656_p10 = scmp.lt.u32.totalorder %s1648_s9, %s2177_s27 }
 0x6f6   : > { %p1650_p8 = pnand %p1649_p2, %p2336_p0 }
 0x6f7   : > { %p1655_p6 = por %p1654_p1, %p1653_p12 }
 0x6f8   : > { %p1651_p11 = pneg %p1650_p8 }
 0x6f9   : > { %p1657_p4 = por %p1656_p10, %p1655_p6 }
 0x6fb   : > { %p1658_p9 = pnand %p1657_p4, %p1651_p11 }
 0x6fd   : > { %1661 = shalt.err (!%p1658_p9)
}
 0x6fe   : > { %s1759_s11 = smov 64   ;;  %s1760_s7 = smov 4  }
 0x6ff   : > { %1361 = dma.vmem_to_hbm [thread:$0]  (%p2336_p0), %s2180_s1, 128, %s2177_s27, %s1015_s3, %s1759_s11, %s1759_s11, %s1760_s7  }
 0x700   : > { %s2337_s13 = sld [smem:[#allocation29_spill]]  ;;  %s2338_s28 = sld [smem:[#allocation30_spill]] }
 0x701   : > { %s493_s23 = scalar_lea.vmem [#allocation13], %s2080_s25  ;;  %s2339_s3 = sld [smem:[#allocation31_spill]] }
 0x702   : > { %s1028_s9 = sshll.u32 %s493_s23, 4  ;;  %s1010_s30 = scalar_lea.sflag [#allocation4], %s2077_s12  ;;  %s2220_s9 = int_to_ptr.vmem [resolvable:$true] %s1028_s9 }
 0x703   : > { %s1662_s26 = scalar_lea.vmem %s2220_s9, 128  ;;  %s1761_s25 = smov [#allocation13]  }
 0x704   : > { %p1663_p13 = scmp.ne.s32.totalorder %s2220_s9, %s1662_s26  ;;  %s1666_s17 = sshll.u32 %s1761_s25, 4  ;;  %s1667_s17 = int_to_ptr.vmem [resolvable:$false] %s1666_s17 }
 0x705   : > { %s1668_s20 = scalar_lea.vmem %s1667_s17, 256  ;;  %p1669_p5 = scmp.lt.s32.totalorder %s2220_s9, %s1667_s17 }
 0x706   : > { %v1256_v27 = vld [vmem:[%s2337_s13] ss:$0 sm:$0xff]  ;;  %p1664_p7 = pnand %p1663_p13, %p2336_p0  ;;  %p1670_p2 = scmp.lt.s32.totalorder %s1668_s20, %s1662_s26 }
 0x707   : > { %v1257_v29 = vld [vmem:[%s2338_s28] ss:$0 sm:$0xff]  ;;  %s2218_s19 = scalar_lea.hbm %s2339_s3, %s1260_s16 }
 0x708   : > { %p1665_p3 = pneg %p1664_p7  ;;  %p1671_p8 = por %p1670_p2, %p1669_p5 }
 0x70a   : > { %p1672_p11 = pnand %p1671_p8, %p1665_p3 }
 0x77e   : > { %v989_v6 = vpop.xlane.xlu0 %988 }
 0x77f   : > { %v990_v24 = vmul.f32 0.03125, %v989_v6 }
 0x781   : > { %v991_v25 = vadd.f32 1e-06, %v990_v24 }
 0x783   : > { %1458 = vrsqrt.f32 %v991_v25 }
 0x78d   : > { %v1459_v26 = vpop.eup %1458 }
 0x78e   : > { %v993_v28 = vmul.f32 %v1459_v26, %v985_v21 }
 0x790   : > { %v1000_v30 = vmul.f32 %v1256_v27, %v993_v28 }
 0x792   : > { %v1007_v31 = vadd.f32 %v1257_v29, %v1000_v30 }
 0x794   : > { %1008 = vst.msk [vmem:[%s493_s23] sm:$0xff] %vm524_vm1, %v1007_v31 }
 0x795   : > { %1675 = shalt.err (!%p1672_p11)
}
 0x796   : > { %s1676_s12 = scalar_lea.hbm %s2218_s19, 128  ;;  %s1680_s11 = scalar_lea.hbm %s2339_s3, 256 }
 0x797   : > { %p1677_p12 = scmp.ne.s32.totalorder %s2218_s19, %s1676_s12  ;;  %p1681_p10 = scmp.lt.u32.totalorder %s2218_s19, %s2339_s3 }
 0x798   : > { %p1682_p4 = scmp.lt.u32.totalorder %s1680_s11, %s1676_s12  ;;  %p1684_p13 = scmp.lt.u32.totalorder %s1676_s12, %s2218_s19 }
 0x799   : > { %p1678_p1 = pnand %p1677_p12, %p2336_p0 }
 0x79a   : > { %p1683_p9 = por %p1682_p4, %p1681_p10 }
 0x79b   : > { %p1679_p6 = pneg %p1678_p1 }
 0x79c   : > { %p1685_p7 = por %p1684_p13, %p1683_p9 }
 0x79e   : > { %p1686_p3 = pnand %p1685_p7, %p1679_p6 }
 0x7a0   : > { %1689 = shalt.err (!%p1686_p3)
}
 0x7a1   : > { %1360 = dma.vmem_to_hbm [thread:$0]  (%p2336_p0), %s2220_s9, 128, %s2218_s19, %s1010_s30  }
 0x7a2 PF: > { %s2340_s18 = sld [smem:[#allocation22_spill]]  ;;  %s2341_s13 = sld [smem:[#allocation24_spill]] }
 0x7a3   : > { %s2342_s24 = sld [smem:[#allocation23_spill]] }
 0x7a8   : > { %s1056_s21 = sand.u32 1, %s2340_s18   ;;  %p2343_p5 = scmp.ne.s32.totalorder %s2341_s13, 0 }
 0x7a9   : > { %p2344_p2 = scmp.ge.s32.totalorder %s2342_s24, 2  ;;  %s1057_s28 = scalar_lea.sflag [#allocation4], %s1056_s21 }
 0x7ab   : > { %p1385_p8 = pnand %p2344_p2, %p2343_p5 }
 0x7ad   : > { %1723 = dma.done.wait (!%p1385_p8), %s1057_s28, 128  }
 0x7ae   : > { %1725 = vsyncadd (!%p1385_p8), %s1057_s28, 4294967168  ;;  %s1066_s23 = scalar_lea.sflag [#allocation15], %s1056_s21 }
 0x7af   : > { %1727 = dma.done.wait (!%p1385_p8), %s1066_s23, 128  }
 0x7b0   : > { %1729 = vsyncadd (!%p1385_p8), %s1066_s23, 4294967168  ;;  %s2345_s16 = sld [smem:[#allocation25_spill]]  ;;  %s2346_s22 = sld [smem:[#allocation26_spill]] }
 0x7b1   : > { %s2347_s13 = smov %s1736_s14  ;;  %s2348_s14 = smov %s1740_s15 }
 0x7b6   : > { %p32_p0 = scmp.ge.s32.totalorder %s2345_s16, 4   ;;  %s2349_s15 = smov %s2346_s22 }
 0x7b8   :  { %34 = sbr.rel (!%p32_p0) target bundleno = 18 (0x12), region = 155 }
 0x7bf   :  { %1071 = vsyncpa [#allocation3], 1 }
 0x7c0   :  { %1073 = vsyncpa [#allocation3 + $0x1], 1 }
 0x7c1   :  { %1074 = vsyncpa [#allocation6], 1 }
 0x7c2   :  { %1076 = vsyncpa [#allocation6 + $0x1], 1 }
 0x7c3   :  { %1077 = vsyncpa [#allocation9], 1 }
 0x7c4   :  { %1078 = vsyncpa [#allocation12], 1 }
 0x7c5   :  { %1079 = vsyncpa [#allocation4], 1 }
 0x7c6   :  { %1081 = vsyncpa [#allocation4 + $0x1], 1 }
 0x7c7   :  { %1082 = vsyncpa [#allocation15], 1 }
 0x7c8   :  { %1084 = vsyncpa [#allocation15 + $0x1], 1 }

</bundles_post_ra>
